<compile_context>
chip_gen: v5e
topology: v5e:2x2
jax: 0.10.0
libtpu: 0.0.40
codegen_flags: <defaults>
</compile_context>

<pallas_src>
import math

import jax
import jax.numpy as jnp
from jax.experimental import pallas as pl
from jax.experimental.pallas import tpu as pltpu

_LANE = 128


def _make_pinn_kernel(layer_sizes, bias_col):
    """Build the fused MLP kernel for a static layer config."""
    n_layers = len(layer_sizes) - 1

    def kernel(x_ref, p_ref, o_ref):
        def swish(z):
            return z * jax.nn.sigmoid(z)

        def linear(l, h):
            d_i, d_o = layer_sizes[l], layer_sizes[l + 1]
            w = p_ref[l]                                   # (max_out, bias_col+1)
            y = jnp.dot(w[0:d_o, 0:d_i], h,
                        preferred_element_type=jnp.float32)
            return y + w[0:d_o, bias_col:bias_col + 1]     # bias broadcast over lanes

        # ---- Layer 0: contraction depth == dim_input (3) -> VPU FMAs, skip MXU ----
        d_i0, d_o0 = layer_sizes[0], layer_sizes[1]
        x = x_ref[...]                                     # (dim_input, tile_n)
        w0 = p_ref[0]
        h = jnp.broadcast_to(w0[0:d_o0, bias_col:bias_col + 1],
                             (d_o0, x.shape[1]))           # start from the bias
        for k in range(d_i0):
            h = h + w0[0:d_o0, k:k + 1] * x[k:k + 1, :]
        h = swish(h)

        # ---- Hidden layers on the MXU (batch on the lane axis) ----
        for l in range(1, n_layers - 1):
            h = swish(linear(l, h))

        # ---- Final layer: no activation ----
        o_ref[...] = linear(n_layers - 1, h).astype(o_ref.dtype)

    return kernel


def _pack_params(params):
    """Fold [(W(out,in), b(out,)), ...] into one (L, max_out, max_in+1) tensor."""
    max_in = max(w.shape[1] for w, _ in params)
    max_out = max(w.shape[0] for w, _ in params)
    packed = jnp.zeros((len(params), max_out, max_in + 1), jnp.float32)
    for l, (w, b) in enumerate(params):
        o, i = w.shape
        packed = packed.at[l, :o, :i].set(w)
        packed = packed.at[l, :o, max_in].set(b)
    return packed, max_in


def pinn_forward(x, params, *, tile_n=2048):
    """x: (N, dim_input) f32; params: list of (W(out,in), b(out,)). Returns (N, 1)."""
    N, d_in = x.shape
    layer_sizes = [params[0][0].shape[1]] + [w.shape[0] for w, _ in params]
    assert d_in == layer_sizes[0]
    d_out = layer_sizes[-1]

    packed, bias_col = _pack_params(params)

    # Batch on the lane (last) axis -> lane-dense activations & unmasked stores.
    x_t = x.T.astype(jnp.float32)                          # (d_in, N)

    # Pad the batch to a multiple of the lane width; pick a big row tile but
    # keep the grid length >= 2 so "parallel" can shard across v7x's 2 TCs.
    n_pad = pl.cdiv(N, _LANE) * _LANE
    eff_tile = min(tile_n, n_pad)
    eff_tile = max(_LANE, (eff_tile // _LANE) * _LANE)
    if n_pad >= 2 * _LANE and pl.cdiv(n_pad, eff_tile) < 2:
        eff_tile = max(_LANE, ((n_pad // 2) // _LANE) * _LANE)
    n_pad = pl.cdiv(n_pad, eff_tile) * eff_tile
    if n_pad != N:
        x_t = jnp.pad(x_t, ((0, 0), (0, n_pad - N)))
    grid = n_pad // eff_tile

    flops = 2 * n_pad * sum(w.shape[0] * w.shape[1] for w, _ in params)
    transc = n_pad * sum(w.shape[0] for w, _ in params[:-1])  # one sigmoid / hidden unit
    bytes_acc = 4 * n_pad * (d_in + d_out) + 4 * int(packed.size)
    cost = pl.CostEstimate(flops=flops, transcendentals=transc,
                           bytes_accessed=bytes_acc)

    kernel = _make_pinn_kernel(tuple(layer_sizes), bias_col)

    y_t = pl.pallas_call(
        kernel,
        out_shape=jax.ShapeDtypeStruct((d_out, n_pad), jnp.float32),
        grid_spec=pltpu.PrefetchScalarGridSpec(
            num_scalar_prefetch=0,
            grid=(grid,),
            in_specs=[
                pl.BlockSpec((d_in, eff_tile), lambda i: (0, i)),
                pl.BlockSpec(packed.shape, lambda i: (0, 0, 0)),  # constant, tiny
            ],
            out_specs=pl.BlockSpec((d_out, eff_tile), lambda i: (0, i)),
        ),
        compiler_params=pltpu.CompilerParams(
            dimension_semantics=("parallel",),
            vmem_limit_bytes=48 * 1024 * 1024,   # > defaults, headroom on v7x 64 MiB
        ),
        cost_estimate=cost,
    )(x_t, packed)

    return y_t[:, :N].T                                     # back to (N, d_out)


# ----------------------------- reference / init -----------------------------

def xavier_uniform(key, fan_out, fan_in):
    # Matches torch.nn.init.xavier_uniform_ (gain=1); weight stored (out, in).
    bound = math.sqrt(6.0 / (fan_in + fan_out))
    return jax.random.uniform(key, (fan_out, fan_in), jnp.float32,
                              minval=-bound, maxval=bound)


def init_params(key, layer_sizes):
    params = []
    for i in range(len(layer_sizes) - 1):
        key, sub = jax.random.split(key)
        w = xavier_uniform(sub, layer_sizes[i + 1], layer_sizes[i])
        b = jnp.zeros((layer_sizes[i + 1],), jnp.float32)   # constant_(bias, 0)
        params.append((w, b))
    return params


def reference_forward(x, params):
    h = x
    for w, b in params[:-1]:
        h = h @ w.T + b
        h = h * jax.nn.sigmoid(h)  # Swish
    w, b = params[-1]
    return h @ w.T + b


if __name__ == "__main__":
    key = jax.random.PRNGKey(0)

    dim_input = 3
    layer_sizes = [dim_input, 32, 32, 32, 1]   # PINN_T(layers) with 3 hidden layers
    k_x, k_p = jax.random.split(key)
    params = init_params(k_p, layer_sizes)

    # Main check (aligned batch; tile logic yields tile=128, grid=2).
    N = 256
    x = jax.random.normal(k_x, (N, dim_input), jnp.float32)
    out = jax.block_until_ready(pinn_forward(x, params))
    ref = reference_forward(x, params)
    assert out.shape == (N, 1)
    assert jnp.allclose(out, ref, atol=1e-5, rtol=1e-5), "mismatch vs reference"

    # Ragged batch (exercises cdiv + zero-padding path; no divisibility assert).
    N2 = 200
    x2 = jax.random.normal(k_x, (N2, dim_input), jnp.float32)
    out2 = jax.block_until_ready(pinn_forward(x2, params))
    ref2 = reference_forward(x2, params)
    assert out2.shape == (N2, 1)
    assert jnp.allclose(out2, ref2, atol=1e-5, rtol=1e-5), "mismatch vs reference (ragged)"

    print("KERNEL_OK")
</pallas_src>

<mosaic_0001>
module attributes {stable_mosaic.version = 11 : i64} {
  func.func @kernel(%arg0: i32, %arg1: memref<3x128xf32, #tpu.memory_space<vmem>>, %arg2: memref<4x32x33xf32, #tpu.memory_space<vmem>>, %arg3: memref<1x128xf32, #tpu.memory_space<vmem>>) attributes {dimension_semantics = [#tpu.dimension_semantics<parallel>], iteration_bounds = array<i64: 2>, scalar_prefetch = 0 : i64, scratch_operands = 0 : i64, tpu.core_type = #tpu.core_type<tc>, window_params = [{transform_indices = @transform_0, window_bounds = array<i64: 3, 128>}, {pipeline_mode = #tpu.pipeline_mode<synchronous>, transform_indices = @transform_1, window_bounds = array<i64: 4, 32, 33>}, {transform_indices = @transform_2, window_bounds = array<i64: 1, 128>}]} {
    %c0 = arith.constant 0 : index
    %c0_0 = arith.constant 0 : index
    %0 = vector.load %arg1[%c0, %c0_0] : memref<3x128xf32, #tpu.memory_space<vmem>>, vector<3x128xf32>
    %c0_1 = arith.constant 0 : index
    %c0_2 = arith.constant 0 : index
    %c0_3 = arith.constant 0 : index
    %1 = vector.load %arg2[%c0_1, %c0_2, %c0_3] : memref<4x32x33xf32, #tpu.memory_space<vmem>>, vector<1x32x33xf32>
    %2 = vector.shape_cast %1 : vector<1x32x33xf32> to vector<32x33xf32>
    %3 = vector.extract_strided_slice %2 {offsets = [0, 32], sizes = [32, 1], strides = [1, 1]} : vector<32x33xf32> to vector<32x1xf32>
    %4 = vector.shape_cast %3 : vector<32x1xf32> to vector<32x1xf32>
    %5 = vector.broadcast %4 : vector<32x1xf32> to vector<32x128xf32>
    %6 = vector.extract_strided_slice %2 {offsets = [0, 0], sizes = [32, 1], strides = [1, 1]} : vector<32x33xf32> to vector<32x1xf32>
    %7 = vector.extract_strided_slice %0 {offsets = [0, 0], sizes = [1, 128], strides = [1, 1]} : vector<3x128xf32> to vector<1x128xf32>
    %8 = vector.broadcast %6 : vector<32x1xf32> to vector<32x128xf32>
    %9 = vector.broadcast %7 : vector<1x128xf32> to vector<32x128xf32>
    %10 = arith.mulf %8, %9 : vector<32x128xf32>
    %11 = arith.addf %5, %10 : vector<32x128xf32>
    %12 = vector.extract_strided_slice %2 {offsets = [0, 1], sizes = [32, 1], strides = [1, 1]} : vector<32x33xf32> to vector<32x1xf32>
    %13 = vector.extract_strided_slice %0 {offsets = [1, 0], sizes = [1, 128], strides = [1, 1]} : vector<3x128xf32> to vector<1x128xf32>
    %14 = vector.broadcast %12 : vector<32x1xf32> to vector<32x128xf32>
    %15 = vector.broadcast %13 : vector<1x128xf32> to vector<32x128xf32>
    %16 = arith.mulf %14, %15 : vector<32x128xf32>
    %17 = arith.addf %11, %16 : vector<32x128xf32>
    %18 = vector.extract_strided_slice %2 {offsets = [0, 2], sizes = [32, 1], strides = [1, 1]} : vector<32x33xf32> to vector<32x1xf32>
    %19 = vector.extract_strided_slice %0 {offsets = [2, 0], sizes = [1, 128], strides = [1, 1]} : vector<3x128xf32> to vector<1x128xf32>
    %20 = vector.broadcast %18 : vector<32x1xf32> to vector<32x128xf32>
    %21 = vector.broadcast %19 : vector<1x128xf32> to vector<32x128xf32>
    %22 = arith.mulf %20, %21 : vector<32x128xf32>
    %23 = arith.addf %17, %22 : vector<32x128xf32>
    %24 = arith.negf %23 : vector<32x128xf32>
    %25 = math.exp %24 : vector<32x128xf32>
    %cst = arith.constant 1.000000e+00 : f32
    %26 = vector.broadcast %cst : f32 to vector<32x128xf32>
    %27 = arith.addf %26, %25 : vector<32x128xf32>
    %28 = arith.divf %26, %27 : vector<32x128xf32>
    %29 = arith.mulf %23, %28 : vector<32x128xf32>
    %c1 = arith.constant 1 : index
    %c0_4 = arith.constant 0 : index
    %c0_5 = arith.constant 0 : index
    %30 = vector.load %arg2[%c1, %c0_4, %c0_5] : memref<4x32x33xf32, #tpu.memory_space<vmem>>, vector<1x32x33xf32>
    %31 = vector.shape_cast %30 : vector<1x32x33xf32> to vector<32x33xf32>
    %32 = vector.extract_strided_slice %31 {offsets = [0, 0], sizes = [32, 32], strides = [1, 1]} : vector<32x33xf32> to vector<32x32xf32>
    %cst_6 = arith.constant dense<0.000000e+00> : vector<32x128xf32>
    %33 = tpu.matmul %32, %29, %cst_6 {dimension_numbers = #tpu.dot_dimension_numbers<[1], [0], [0], [1], [0, 0, 1, 1], [], []>} : vector<32x32xf32>, vector<32x128xf32>, vector<32x128xf32> -> vector<32x128xf32>
    %34 = vector.extract_strided_slice %31 {offsets = [0, 32], sizes = [32, 1], strides = [1, 1]} : vector<32x33xf32> to vector<32x1xf32>
    %35 = vector.broadcast %34 : vector<32x1xf32> to vector<32x128xf32>
    %36 = arith.addf %33, %35 : vector<32x128xf32>
    %37 = arith.negf %36 : vector<32x128xf32>
    %38 = math.exp %37 : vector<32x128xf32>
    %cst_7 = arith.constant 1.000000e+00 : f32
    %39 = vector.broadcast %cst_7 : f32 to vector<32x128xf32>
    %40 = arith.addf %39, %38 : vector<32x128xf32>
    %41 = arith.divf %39, %40 : vector<32x128xf32>
    %42 = arith.mulf %36, %41 : vector<32x128xf32>
    %c2 = arith.constant 2 : index
    %c0_8 = arith.constant 0 : index
    %c0_9 = arith.constant 0 : index
    %43 = vector.load %arg2[%c2, %c0_8, %c0_9] : memref<4x32x33xf32, #tpu.memory_space<vmem>>, vector<1x32x33xf32>
    %44 = vector.shape_cast %43 : vector<1x32x33xf32> to vector<32x33xf32>
    %45 = vector.extract_strided_slice %44 {offsets = [0, 0], sizes = [32, 32], strides = [1, 1]} : vector<32x33xf32> to vector<32x32xf32>
    %cst_10 = arith.constant dense<0.000000e+00> : vector<32x128xf32>
    %46 = tpu.matmul %45, %42, %cst_10 {dimension_numbers = #tpu.dot_dimension_numbers<[1], [0], [0], [1], [0, 0, 1, 1], [], []>} : vector<32x32xf32>, vector<32x128xf32>, vector<32x128xf32> -> vector<32x128xf32>
    %47 = vector.extract_strided_slice %44 {offsets = [0, 32], sizes = [32, 1], strides = [1, 1]} : vector<32x33xf32> to vector<32x1xf32>
    %48 = vector.broadcast %47 : vector<32x1xf32> to vector<32x128xf32>
    %49 = arith.addf %46, %48 : vector<32x128xf32>
    %50 = arith.negf %49 : vector<32x128xf32>
    %51 = math.exp %50 : vector<32x128xf32>
    %cst_11 = arith.constant 1.000000e+00 : f32
    %52 = vector.broadcast %cst_11 : f32 to vector<32x128xf32>
    %53 = arith.addf %52, %51 : vector<32x128xf32>
    %54 = arith.divf %52, %53 : vector<32x128xf32>
    %55 = arith.mulf %49, %54 : vector<32x128xf32>
    %c3 = arith.constant 3 : index
    %c0_12 = arith.constant 0 : index
    %c0_13 = arith.constant 0 : index
    %56 = vector.load %arg2[%c3, %c0_12, %c0_13] : memref<4x32x33xf32, #tpu.memory_space<vmem>>, vector<1x32x33xf32>
    %57 = vector.shape_cast %56 : vector<1x32x33xf32> to vector<32x33xf32>
    %58 = vector.extract_strided_slice %57 {offsets = [0, 0], sizes = [1, 32], strides = [1, 1]} : vector<32x33xf32> to vector<1x32xf32>
    %cst_14 = arith.constant dense<0.000000e+00> : vector<1x128xf32>
    %59 = tpu.matmul %58, %55, %cst_14 {dimension_numbers = #tpu.dot_dimension_numbers<[1], [0], [0], [1], [0, 0, 1, 1], [], []>} : vector<1x32xf32>, vector<32x128xf32>, vector<1x128xf32> -> vector<1x128xf32>
    %60 = vector.extract_strided_slice %57 {offsets = [0, 32], sizes = [1, 1], strides = [1, 1]} : vector<32x33xf32> to vector<1x1xf32>
    %61 = vector.broadcast %60 : vector<1x1xf32> to vector<1x128xf32>
    %62 = arith.addf %59, %61 : vector<1x128xf32>
    %c0_15 = arith.constant 0 : index
    %c0_16 = arith.constant 0 : index
    %63 = vector.load %arg3[%c0_15, %c0_16] : memref<1x128xf32, #tpu.memory_space<vmem>>, vector<1x128xf32>
    tpu.vector_store %arg3[%c0_15, %c0_16], %62 {strides = array<i32>} : memref<1x128xf32, #tpu.memory_space<vmem>>, vector<1x128xf32>,
    return
  }
  func.func @transform_0(%arg0: i32) -> (i32, i32) {
    %c0_i32 = arith.constant 0 : i32
    %c0_i32_0 = arith.constant 0 : i32
    return %c0_i32, %arg0 : i32, i32
  }
  func.func @transform_1(%arg0: i32) -> (i32, i32, i32) {
    %c0_i32 = arith.constant 0 : i32
    %c0_i32_0 = arith.constant 0 : i32
    %c0_i32_1 = arith.constant 0 : i32
    %c0_i32_2 = arith.constant 0 : i32
    return %c0_i32, %c0_i32_0, %c0_i32_1 : i32, i32, i32
  }
  func.func @transform_2(%arg0: i32) -> (i32, i32) {
    %c0_i32 = arith.constant 0 : i32
    %c0_i32_0 = arith.constant 0 : i32
    return %c0_i32, %arg0 : i32, i32
  }
}

</mosaic_0001>

<bundles_post_ra>
// kernel: tpu_custom_call.1
= control target key start
LH: loop header
LB: loop body
LE: loop exit
PB: predicated region body
PF: predicated region fallthrough
CT: control target
= control target key end

     0   :  { %7 = vsyncpa [#allocation3], 0  ;;  %s1374_s0 = inlined_call_operand.hbm [shape: f32[3,256], index: 0, kind: input, shape index: {}]   ;;  %s1375_s1 = inlined_call_operand.hbm [shape: f32[4,32,33], index: 1, kind: input, shape index: {}]   ;;  %s1376_s2 = inlined_call_operand.hbm [shape: f32[1,256], index: 2, kind: output, shape index: {}]  }
   0x1   :  { %9 = vsyncpa [#allocation3 + $0x1], 0 }
   0x2   :  { %10 = vsyncpa [#allocation6], 0 }
   0x3   :  { %11 = vsyncpa [#allocation4], 0 }
   0x4   :  { %13 = vsyncpa [#allocation4 + $0x1], 0  ;;  %s1082_s9 = smov 0   ;;  %s1084_s10 = smov 0  }
   0x5   :  { %s1086_s11 = smov 0   ;;  %s1088_s12 = smov 0  }
   0x6 LB: > { %s108_s15 = sshll.u32 %s1375_s1, 4  ;;  %s1106_s16 = sadd.s32 4294967295, %s1058_s12   ;;  %s1058_s12 = sphi %s1088_s12, %s1396_s12   ;;  %s1054_s11 = sphi %s1086_s11, %s1395_s11   ;;  %s1050_s10 = sphi %s1084_s10, %s1394_s10   ;;  %s1046_s9 = sphi %s1082_s9, %s1393_s9   ;;  %s109_s15 = int_to_ptr.hbm [resolvable:$true] %s108_s15 }
   0x7   : > { %p762_p0 = scmp.ge.s32.totalorder %s1058_s12, 1  ;;  %p40_p1 = scmp.eq.s32.totalorder %s1106_s16, 0 }
   0x8   : > { %p97_p2 = scmp.lt.s32.totalorder %s1058_s12, 3  ;;  %s1060_s18 = smov [#allocation5]  }
   0x9   : > { %s110_s19 = sshll.u32 %s1060_s18, 4  ;;  %s1061_s20 = smov 128   ;;  %s111_s19 = int_to_ptr.vmem [resolvable:$true] %s110_s19 }
   0xa   : > { %p1111_p3 = pnand %p762_p0, %p97_p2  ;;  %s1062_s21 = smov 8  }
   0xb   : > { %s761_s22 = sadd.s32 4294967294, %s1058_s12   ;;  %s1122_s23 = sadd.s32 1, %s1058_s12  }
   0xc   : > { %p809_p4 = pneg %p1111_p3  ;;  %s26_s24 = sadd.s32 1, %s1054_s11 }
   0xd   : > { %s23_s25 = ssub.s32 %s1058_s12, %s1122_s23  ;;  %p33_p7 = scmp.ne.s32.totalorder %s1054_s11, %s1050_s10 }
   0xe   : > { %p810_p6 = pnand %p809_p4, %p40_p1  ;;  %p24_p8 = scmp.eq.s32.totalorder %s23_s25, 0 }
   0xf   : > { %p34_p9 = scmp.eq.s32.totalorder %s1058_s12, 0  ;;  %p39_p10 = scmp.ne.s32.totalorder %s1050_s10, %s1046_s9 }
  0x10   : > { %812 = dma.hbm_to_vmem [thread:$0]  (!%p810_p6), %s109_s15, 2048, %s111_s19, [#allocation6], %s1061_s20, %s1061_s20, %s1062_s21  }
  0x11   : > { %p84_p11 = scmp.eq.s32.totalorder %s1106_s16, 1  ;;  %p1138_p12 = por %p40_p1, %p39_p10 }
  0x12   : > { %s1134_s26 = scalar_select %p24_p8, %s1054_s11, %s26_s24  }
  0x13   : > { %p1142_p13 = por %p84_p11, %p33_p7  ;;  %p90_p0 = scmp.eq.s32.totalorder %s761_s22, 1 }
  0x14   : > { %p35_p2 = por %p34_p9, %p33_p7  ;;  %s124_s29 = sand.u32 1, %s1054_s11  }
  0x15   : > { %p1147_p4 = por %p90_p0, %p39_p10  ;;  %p822_p6 = scmp.lt.s32.totalorder %s1058_s12, 2 }
  0x16   : > { %s765_s3 = sshll.u32 %s124_s29, 2  ;;  %s766_s4 = sshll.u32 %s1058_s12, 2 }
  0x17   : > { %s132_s7 = scalar_lea.hbm %s1374_s0, %s766_s4  ;;  %s128_s13 = scalar_lea.vmem [#allocation2], %s765_s3 }
  0x18   : > { %s134_s8 = sshll.u32 %s132_s7, 4  ;;  %s136_s14 = sshll.u32 %s128_s13, 4  ;;  %s135_s8 = int_to_ptr.hbm [resolvable:$true] %s134_s8  ;;  %s137_s14 = int_to_ptr.vmem [resolvable:$true] %s136_s14 }
  0x19   : > { %p1156_p8 = pnand %p822_p6, %p35_p2  ;;  %s125_s18 = scalar_lea.sflag [#allocation3], %s124_s29 }
  0x1a   : > { %s958_s19 = sshra.s32 %s135_s8, 4  ;;  %s965_s24 = scalar_lea.hbm %s1374_s0, 8  ;;  %s959_s19 = int_to_ptr.hbm [resolvable:$true] %s958_s19 }
  0x1b   : > { %s960_s20 = scalar_lea.hbm %s959_s19, 4  ;;  %p962_p9 = pneg %p1156_p8 }
  0x1c   : > { %p961_p7 = scmp.ne.s32.totalorder %s959_s19, %s960_s20  ;;  %p966_p0 = scmp.lt.s32.totalorder %s959_s19, %s1374_s0 }
  0x1d   : > { %p967_p2 = scmp.lt.s32.totalorder %s965_s24, %s960_s20 }
  0x1e   : > { %p963_p10 = pnand %p962_p9, %p961_p7 }
  0x1f   : > { %p968_p6 = por %p967_p2, %p966_p0 }
  0x20   : > { %p964_p11 = pneg %p963_p10 }
  0x22   : > { %p969_p5 = pnand %p968_p6, %p964_p11 }
  0x24   : > { %972 = shalt.err (!%p969_p5)
}
  0x25   : > { %816 = dma.hbm_to_vmem [thread:$0]  (!%p1156_p8), %s135_s8, 64, %s137_s14, %s125_s18  }
  0x26   : > { %145 = sbr.rel (%p1111_p3) target bundleno = 750 (0x2ee), region = 28  ;;  %s1173_s29 = sand.u32 (!%p1111_p3), 1, %s1050_s10  }
  0x27   : > { %s768_s4 = sshll.u32 (!%p1111_p3), %s1173_s29, 2  ;;  %s148_s5 = scalar_lea.sflag (!%p1111_p3), [#allocation3], %s1173_s29 }
  0x28   : > { %s1177_s6 = scalar_lea.vmem (!%p1111_p3), [#allocation2], %s768_s4 }
  0x2b   : > { %1033 = dma.done.wait (%p1138_p12), %s148_s5, 64  }
  0x2c   : > { %1035 = vsyncadd (%p1138_p12), %s148_s5, 4294967232 }
  0x2d   : > { %1037 = dma.done.wait (%p40_p1), [#allocation6], 2048  }
  0x2e   : > { %1039 = vsyncadd (%p40_p1), [#allocation6], 4294965248  ;;  %v1063_v0 = vmov 0   ;;  %v1064_v1 = vmov 32   ;;  %v181_v2 = vld [vmem:[#allocation5 + $0x18] sm:$0xff]  ;;  %v180_v3 = vld [vmem:[#allocation5 + $0x10] sm:$0xff]  ;;  %s681_s7 = scalar_lea.hbm %s1376_s2, %s1106_s16 }
  0x2f   : > { %866 = vset.pattern.permute.xlu1 %v1063_v0  ;;  %864 = vset.pattern.permute.xlu0 %v1063_v0  ;;  %v1065_v4 = vmov 1   ;;  %v179_v5 = vld [vmem:[#allocation5 + $0x8] sm:$0xff]  ;;  %v1066_v6 = vmov 2   ;;  %v178_v7 = vld [vmem:[#allocation5] sm:$0xff]  ;;  %v177_v12 = vld [vmem:[%s1177_s6] sm:$0x7] }
  0x30   : > { %868 = vset.pattern.permute.xlu2 %v1064_v1  ;;  %215 = vperm.xlu0 %864, %v181_v2   ;;  %v218_v13 = vperm.slane %v177_v12, 0  ;;  %v243_v16 = vperm.slane %v177_v12, 1  ;;  %v268_v17 = vperm.slane %v177_v12, 2  ;;  %s176_s8 = scalar_lea.vmem [#allocation7], %s1173_s29  ;;  %s685_s14 = sshll.u32 %s681_s7, 4  ;;  %s686_s14 = int_to_ptr.hbm [resolvable:$true] %s685_s14 }
  0x31   : > { %211 = vperm.xlu1 %866, %v180_v3   ;;  %194 = vperm.xlu2 %868, %v180_v3   ;;  %s683_s13 = sshll.u32 %s176_s8, 4  ;;  %s673_s15 = scalar_lea.sflag [#allocation4], %s1173_s29  ;;  %s684_s13 = int_to_ptr.vmem [resolvable:$true] %s683_s13 }
  0x32   : > { %s1002_s18 = sshra.s32 %s686_s14, 4  ;;  %s1008_s16 = scalar_lea.hbm %s1376_s2, 2  ;;  %s1003_s18 = int_to_ptr.hbm [resolvable:$true] %s1002_s18 }
  0x33   : > { %s1004_s19 = scalar_lea.hbm %s1003_s18, 1  ;;  %p1009_p12 = scmp.lt.s32.totalorder %s1003_s18, %s1376_s2 }
  0x34   : > { %p1005_p1 = scmp.ne.s32.totalorder %s1003_s18, %s1004_s19  ;;  %p1010_p8 = scmp.lt.s32.totalorder %s1008_s16, %s1004_s19 }
  0x36   : > { %p1006_p3 = pnand %p1005_p1, %p1142_p13  ;;  %p1011_p7 = por %p1010_p8, %p1009_p12 }
  0x38   : > { %865 = vset.pattern.permute.xlu0 %v1064_v1  ;;  %p1007_p5 = pneg %p1006_p3 }
  0x39   : > { %867 = vset.pattern.permute.xlu1 %v1065_v4  ;;  %199 = vperm.xlu0 %865, %v181_v2  }
  0x3a   : > { %240 = vperm.xlu1 %867, %v181_v2   ;;  %869 = vset.pattern.permute.xlu2 %v1063_v0  ;;  %p1012_p9 = pnand %p1011_p7, %p1007_p5 }
  0x3b   : > { %207 = vperm.xlu2 %869, %v179_v5  }
  0x41   : > { %189 = vperm.xlu0 %865, %v179_v5  }
  0x42   : > { %236 = vperm.xlu1 %867, %v180_v3  }
  0x43   : > { %870 = vset.pattern.permute.xlu2 %v1066_v6 }
  0x44   : > { %265 = vperm.xlu2 %870, %v181_v2  }
  0x49   : > { %873 = vset.pattern.permute.xlu0 %v1066_v6 }
  0x4a   : > { %871 = vset.pattern.permute.xlu1 %v1063_v0  ;;  %261 = vperm.xlu0 %873, %v180_v3  }
  0x4b   : > { %203 = vperm.xlu1 %871, %v178_v7  }
  0x4c   : > { %872 = vset.pattern.permute.xlu2 %v1065_v4 }
  0x4d   : > { %232 = vperm.xlu2 %872, %v179_v5  }
  0x52   : > { %877 = vset.pattern.permute.xlu0 %v1064_v1 }
  0x53   : > { %874 = vset.pattern.permute.xlu1 %v1064_v1 }
  0x54   : > { %184 = vperm.xlu1 %874, %v178_v7  }
  0x55   : > { %228 = vperm.xlu2 %872, %v178_v7  }
  0x5c   : > { %875 = vset.pattern.permute.xlu1 %v1066_v6 }
  0x5d   : > { %257 = vperm.xlu1 %875, %v179_v5   ;;  %876 = vset.pattern.permute.xlu2 %v1066_v6 }
  0x5e   : > { %253 = vperm.xlu2 %876, %v178_v7  }
  0x65   : > { %878 = vset.pattern.permute.xlu1 %v1064_v1 }
  0x66   : > { %879 = vset.pattern.permute.xlu2 %v1064_v1 }
  0x8b   : > { %v195_v8 = vpop.permute.xlu2 %194 }
  0x95   : > { %v208_v9 = vpop.permute.xlu2 %207 }
  0x96   : > { %v220_v55 = vmul.f32 %v218_v13, %v208_v9 }
  0x9e   : > { %v266_v14 = vpop.permute.xlu2 %265 }
  0x9f   : > { %v272_v22 = vmul.f32 %v268_v17, %v266_v14 }
  0xa2   : > { %v216_v11 = vpop.permute.xlu0 %215 }
  0xa3   : > { %v212_v10 = vpop.permute.xlu1 %211  ;;  %v222_v15 = vmul.f32 %v218_v13, %v216_v11  ;;  %v1199_v11 = vld [vmem:[#allocation5 + $0x30] sm:$0xff] }
  0xa4   : > { %v221_v29 = vmul.f32 %v218_v13, %v212_v10  ;;  %v1197_v10 = vld [vmem:[#allocation5 + $0x28] sm:$0xff]  ;;  %374 = vperm.xlu1 %878, %v1199_v11  }
  0xa5   : > { %369 = vperm.xlu2 %879, %v1197_v10  }
  0xa6   : > { %v225_v33 = vadd.f32 %v221_v29, %v195_v8 }
  0xa7   : > { %v233_v25 = vpop.permute.xlu2 %232 }
  0xa8   : > { %v245_v60 = vmul.f32 %v243_v16, %v233_v25 }
  0xab   : > { %v200_v18 = vpop.permute.xlu0 %199 }
  0xac   : > { %v241_v19 = vpop.permute.xlu1 %240  ;;  %v226_v20 = vadd.f32 %v222_v15, %v200_v18 }
  0xad   : > { %v247_v21 = vmul.f32 %v243_v16, %v241_v19 }
  0xaf   : > { %v251_v23 = vadd.f32 %v247_v21, %v226_v20  ;;  %v229_v31 = vpop.permute.xlu2 %228 }
  0xb0   : > { %v244_v46 = vmul.f32 %v243_v16, %v229_v31  ;;  %v1204_v31 = vld [vmem:[#allocation5 + $0x50] sm:$0xff] }
  0xb1   : > { %v276_v24 = vadd.f32 %v272_v22, %v251_v23  ;;  %v358_v23 = vld [vmem:[#allocation5 + $0x20] sm:$0xff] }
  0xb2   : > { %364 = vperm.xlu1 %878, %v358_v23  }
  0xb3   : > { %v773_v26 = vmul.f32 -1.442695, %v276_v24  ;;  %v190_v28 = vpop.permute.xlu0 %189 }
  0xb4   : > { %v237_v27 = vpop.permute.xlu1 %236  ;;  %v224_v59 = vadd.f32 %v220_v55, %v190_v28 }
  0xb5   : > { %880 = vpow2.f32 %v773_v26  ;;  %v246_v30 = vmul.f32 %v243_v16, %v237_v27 }
  0xb6   : > { %v249_v3 = vadd.f32 %v245_v60, %v224_v59 }
  0xb7   : > { %v250_v37 = vadd.f32 %v246_v30, %v225_v33 }
  0xb8   : > { %v254_v42 = vpop.permute.xlu2 %253 }
  0xb9   : > { %v269_v48 = vmul.f32 %v268_v17, %v254_v42  ;;  %v1213_v42 = vld [vmem:[#allocation5 + $0x60] sm:$0xff] }
  0xbb   : > { %v881_v32 = vpop.eup %880 }
  0xbc   : > { %v292_v34 = vadd.f32 1.0, %v881_v32  ;;  %v262_v35 = vpop.permute.xlu0 %261  ;;  %v1206_v32 = vld [vmem:[#allocation5 + $0x48] sm:$0xff] }
  0xbd   : > { %v204_v36 = vpop.permute.xlu1 %203  ;;  %v271_v38 = vmul.f32 %v268_v17, %v262_v35  ;;  %512 = vperm.xlu1 %878, %v1206_v32  }
  0xbe   : > { %882 = vrcp.f32 %v292_v34  ;;  %v219_v43 = vmul.f32 %v218_v13, %v204_v36  ;;  %v349_v50 = vand.u32 2147483648, %v292_v34  ;;  %v347_v53 = vand.u32 2147483647, %v292_v34 }
  0xbf   : > { %v1188_v39 = vadd.f32 %v271_v38, %v250_v37  ;;  %vm343_vm1 = vweird.f32 %v292_v34 }
  0xc0   : > { %v350_v61 = vor.u32 1.1754944e-38, %v349_v50  ;;  %vm348_vm3 = vcmp.eq.f32.partialorder %v347_v53, 8.507059e+37 }
  0xc1   : > { %v772_v40 = vmul.f32 -1.442695, %v1188_v39 }
  0xc3   : > { %884 = vpow2.f32 %v772_v40 }
  0xc4   : > { %v883_v41 = vpop.eup %882 }
  0xc5   : > { %v339_v44 = vmul.f32 %v883_v41, %v292_v34  ;;  %vm344_vm0 = vweird.f32 %v883_v41  ;;  %v1210_v34 = vld [vmem:[#allocation5 + $0x58] sm:$0xff] }
  0xc6   : > { %v185_v45 = vpop.permute.xlu1 %184  ;;  %vm345_vm2 = vmor %vm343_vm1, %vm344_vm0  ;;  %522 = vperm.xlu2 %879, %v1210_v34   ;;  %vm382_vm0 = vcmask 261120  }
  0xc7   : > { %v223_v47 = vadd.f32 %v219_v43, %v185_v45  ;;  %v340_v49 = vsub.f32 1.0, %v339_v44  ;;  %v1215_v45 = vld [vmem:[#allocation5 + $0x40] sm:$0xff] }
  0xc9   : > { %v248_v51 = vadd.f32 %v244_v46, %v223_v47  ;;  %v341_v52 = vmul.f32 %v883_v41, %v340_v49  ;;  %v885_v54 = vpop.eup %884 }
  0xca   : > { %v291_v56 = vadd.f32 1.0, %v885_v54 }
  0xcb   : > { %v1191_v57 = vadd.f32 %v269_v48, %v248_v51  ;;  %v342_v58 = vadd.f32 %v883_v41, %v341_v52 }
  0xcc   : > { %886 = vrcp.f32 %v291_v56  ;;  %v334_v14 = vand.u32 2147483648, %v291_v56  ;;  %v332_v16 = vand.u32 2147483647, %v291_v56  ;;  %vm328_vm5 = vweird.f32 %v291_v56 }
  0xcd   : > { %v770_v62 = vmul.f32 -1.442695, %v1191_v57  ;;  %v346_v63 = vsel %vm345_vm2, %v883_v41, %v342_v58 }
  0xce   : > { %v351_v0 = vsel %vm348_vm3, %v350_v61, %v346_v63  ;;  %v335_v18 = vor.u32 1.1754944e-38, %v334_v14  ;;  %vm333_vm7 = vcmp.eq.f32.partialorder %v332_v16, 8.507059e+37  ;;  %507 = vperm.xlu2 %879, %v1215_v45  }
  0xcf   : > { %888 = vpow2.f32 %v770_v62  ;;  %v258_v1 = vpop.permute.xlu1 %257  ;;  %v356_v2 = vmul.f32 %v351_v0, %v276_v24  ;;  %v361_v24 = vld [vmem:[#allocation5 + $0x38] sm:$0xff] }
  0xd0   : > { %v270_v4 = vmul.f32 %v268_v17, %v258_v1  ;;  %379 = vperm.xlu0 %877, %v361_v24  }
  0xd1   : > { %403 = vmatpush.msra.mxu0 %v356_v2  ;;  %793 = vmatpush.msra.mxu3 %v356_v2 }
  0xd2   : > { %v1194_v5 = vadd.f32 %v270_v4, %v249_v3  ;;  %v887_v6 = vpop.eup %886 }
  0xd3   : > { %v324_v8 = vmul.f32 %v887_v6, %v291_v56  ;;  %vm329_vm4 = vweird.f32 %v887_v6 }
  0xd4   : > { %v771_v7 = vmul.f32 -1.442695, %v1194_v5  ;;  %vm330_vm6 = vmor %vm328_vm5, %vm329_vm4 }
  0xd5   : > { %v889_v9 = vpop.eup %888  ;;  %v325_v13 = vsub.f32 1.0, %v324_v8 }
  0xd6   : > { %v289_v12 = vadd.f32 1.0, %v889_v9  ;;  %890 = vpow2.f32 %v771_v7 }
  0xd7   : > { %v326_v15 = vmul.f32 %v887_v6, %v325_v13 }
  0xd8   : > { %892 = vrcp.f32 %v289_v12  ;;  %517 = vperm.xlu0 %877, %v1204_v31   ;;  %vm298_vm9 = vweird.f32 %v289_v12  ;;  %v304_v38 = vand.u32 2147483648, %v289_v12  ;;  %v302_v41 = vand.u32 2147483647, %v289_v12 }
  0xd9   : > { %v327_v17 = vadd.f32 %v887_v6, %v326_v15 }
  0xda   : > { %v305_v47 = vor.u32 1.1754944e-38, %v304_v38  ;;  %vm303_vm15 = vcmp.eq.f32.partialorder %v302_v41, 8.507059e+37 }
  0xdb   : > { %v331_v20 = vsel %vm330_vm6, %v887_v6, %v327_v17 }
  0xdc   : > { %v891_v19 = vpop.eup %890  ;;  %v336_v22 = vsel %vm333_vm7, %v335_v18, %v331_v20 }
  0xdd   : > { %v290_v21 = vadd.f32 1.0, %v891_v19  ;;  %v355_v26 = vmul.f32 %v336_v22, %v1188_v39 }
  0xde   : > { %v893_v25 = vpop.eup %892 }
  0xdf   : > { %894 = vrcp.f32 %v290_v21  ;;  %404 = vmatpush.msra.mxu0 %v355_v26  ;;  %794 = vmatpush.msra.mxu3 %v355_v26  ;;  %v294_v27 = vmul.f32 %v893_v25, %v289_v12  ;;  %vm299_vm8 = vweird.f32 %v893_v25  ;;  %v319_v37 = vand.u32 2147483648, %v290_v21 }
  0xe0   : > { %v317_v40 = vand.u32 2147483647, %v290_v21  ;;  %vm300_vm11 = vmor %vm298_vm9, %vm299_vm8  ;;  %vm313_vm12 = vweird.f32 %v290_v21  ;;  %646 = vperm.xlu0 %877, %v1213_v42  }
  0xe1   : > { %v295_v28 = vsub.f32 1.0, %v294_v27  ;;  %v320_v46 = vor.u32 1.1754944e-38, %v319_v37 }
  0xe2   : > { %vm318_vm14 = vcmp.eq.f32.partialorder %v317_v40, 8.507059e+37 }
  0xe3   : > { %v296_v29 = vmul.f32 %v893_v25, %v295_v28 }
  0xe5   : > { %v895_v30 = vpop.eup %894  ;;  %v297_v36 = vadd.f32 %v893_v25, %v296_v29 }
  0xe6   : > { %v309_v33 = vmul.f32 %v895_v30, %v290_v21  ;;  %vm314_vm10 = vweird.f32 %v895_v30 }
  0xe7   : > { %v301_v44 = vsel %vm300_vm11, %v893_v25, %v297_v36  ;;  %vm315_vm13 = vmor %vm313_vm12, %vm314_vm10 }
  0xe8   : > { %v310_v35 = vsub.f32 1.0, %v309_v33  ;;  %v306_v50 = vsel %vm303_vm15, %v305_v47, %v301_v44 }
  0xe9   : > { %v353_v52 = vmul.f32 %v306_v50, %v1191_v57 }
  0xea   : > { %v311_v39 = vmul.f32 %v895_v30, %v310_v35 }
  0xec   : > { %v312_v43 = vadd.f32 %v895_v30, %v311_v39 }
  0xee   : > { %v316_v48 = vsel %vm315_vm13, %v895_v30, %v312_v43 }
  0xef   : > { %v321_v49 = vsel %vm318_vm14, %v320_v46, %v316_v48 }
  0xf0   : > { %v354_v51 = vmul.f32 %v321_v49, %v1194_v5 }
  0xf2   : > { %405 = vmatpush.msra.mxu0 %v354_v51  ;;  %795 = vmatpush.msra.mxu3 %v354_v51 }
  0xf4   : > { %406 = vmatpush.msra.mxu0 %v353_v52  ;;  %796 = vmatpush.msra.mxu3 %v353_v52 }
  0xf5   : > { %774 = vmatmul.msk.f32.vlgmr.msra.gmra.mxu0 %vm382_vm0, %v358_v23  ;;  %775 = vmatmul.msk.f32.vlgmr.msra.gmra.mxu3 %vm382_vm0, %v1197_v10 }
  0xfd   : > { %776 = vmatmul.msk.f32.gmra.mxu3 %vm382_vm0, %v1199_v11 }
  0xff   : > { %v370_v58 = vpop.permute.xlu2 %369 }
 0x105   : > { %777 = vmatmul.msk.f32.gmra.mxu3 %vm382_vm0, %v361_v24 }
 0x116   : > { %v375_v53 = vpop.permute.xlu1 %374 }
 0x124   : > { %v365_v54 = vpop.permute.xlu1 %364 }
 0x142   : > { %v380_v4 = vpop.permute.xlu0 %379 }
 0x172   : > { %v408_v55 = vpop.f32.mrf.mxu0 }
 0x173   : > { %v1227_v56 = vadd.f32 %v408_v55, %v365_v54 }
 0x175   : > { %v778_v60 = vmul.f32 -1.442695, %v1227_v56 }
 0x177   : > { %896 = vpow2.f32 %v778_v60 }
 0x178   : > { %v411_v57 = vpop.f32.mrf.mxu3 }
 0x179   : > { %v1229_v59 = vadd.f32 %v411_v57, %v370_v58 }
 0x17b   : > { %v779_v61 = vmul.f32 -1.442695, %v1229_v59 }
 0x17d   : > { %898 = vpow2.f32 %v779_v61  ;;  %v897_v1 = vpop.eup %896 }
 0x17e   : > { %v1236_v3 = vadd.f32 1.0, %v897_v1 }
 0x180   : > { %v414_v62 = vpop.f32.mrf.mxu3  ;;  %vm441_vm1 = vweird.f32 %v1236_v3  ;;  %v445_v27 = vand.u32 2147483647, %v1236_v3  ;;  %v447_v44 = vand.u32 2147483648, %v1236_v3 }
 0x181   : > { %v1233_v63 = vadd.f32 %v414_v62, %v375_v53 }
 0x182   : > { %v448_v57 = vor.u32 1.1754944e-38, %v447_v44 }
 0x183   : > { %v780_v0 = vmul.f32 -1.442695, %v1233_v63  ;;  %v899_v2 = vpop.eup %898 }
 0x184   : > { %v1238_v5 = vadd.f32 1.0, %v899_v2 }
 0x185   : > { %900 = vpow2.f32 %v780_v0 }
 0x186   : > { %902 = vrcp.f32 %v1236_v3  ;;  %vm456_vm9 = vweird.f32 %v1238_v5  ;;  %v460_v41 = vand.u32 2147483647, %v1238_v5  ;;  %v462_v43 = vand.u32 2147483648, %v1238_v5 }
 0x187   : > { %904 = vrcp.f32 %v1238_v5 }
 0x188   : > { %v417_v6 = vpop.f32.mrf.mxu3  ;;  %v463_v58 = vor.u32 1.1754944e-38, %v462_v43  ;;  %vm461_vm15 = vcmp.eq.f32.partialorder %v460_v41, 8.507059e+37 }
 0x189   : > { %v418_v7 = vadd.f32 %v417_v6, %v380_v4 }
 0x18b   : > { %v901_v8 = vpop.eup %900  ;;  %v781_v9 = vmul.f32 -1.442695, %v418_v7 }
 0x18c   : > { %v434_v10 = vadd.f32 1.0, %v901_v8  ;;  %v1242_v11 = vpop.eup %902 }
 0x18d   : > { %906 = vpow2.f32 %v781_v9  ;;  %v905_v12 = vpop.eup %904  ;;  %v437_v18 = vmul.f32 %v1242_v11, %v1236_v3  ;;  %vm442_vm2 = vweird.f32 %v1242_v11 }
 0x18e   : > { %908 = vrcp.f32 %v434_v10  ;;  %v452_v17 = vmul.f32 %v905_v12, %v1238_v5  ;;  %vm457_vm4 = vweird.f32 %v905_v12  ;;  %vm471_vm5 = vweird.f32 %v434_v10  ;;  %vm1253_vm7 = vmor %vm441_vm1, %vm442_vm2 }
 0x18f   : > { %v438_v21 = vsub.f32 1.0, %v437_v18  ;;  %v475_v33 = vand.u32 2147483647, %v434_v10  ;;  %v477_v35 = vand.u32 2147483648, %v434_v10  ;;  %vm1268_vm11 = vmor %vm456_vm9, %vm457_vm4  ;;  %vm446_vm1 = vcmp.eq.f32.partialorder %v445_v27, 8.507059e+37 }
 0x190   : > { %v453_v20 = vsub.f32 1.0, %v452_v17 }
 0x191   : > { %v439_v26 = vmul.f32 %v1242_v11, %v438_v21  ;;  %v478_v51 = vor.u32 1.1754944e-38, %v477_v35  ;;  %vm476_vm14 = vcmp.eq.f32.partialorder %v475_v33, 8.507059e+37 }
 0x192   : > { %v454_v25 = vmul.f32 %v905_v12, %v453_v20 }
 0x193   : > { %v907_v13 = vpop.eup %906  ;;  %v440_v49 = vadd.f32 %v1242_v11, %v439_v26 }
 0x194   : > { %v909_v14 = vpop.eup %908  ;;  %v435_v15 = vadd.f32 1.0, %v907_v13  ;;  %v455_v38 = vadd.f32 %v905_v12, %v454_v25 }
 0x195   : > { %v467_v16 = vmul.f32 %v909_v14, %v434_v10  ;;  %vm472_vm3 = vweird.f32 %v909_v14  ;;  %v444_v61 = vsel %vm1253_vm7, %v1242_v11, %v440_v49 }
 0x196   : > { %910 = vrcp.f32 %v435_v15  ;;  %v492_v30 = vand.u32 2147483648, %v435_v15  ;;  %v490_v37 = vand.u32 2147483647, %v435_v15  ;;  %vm1257_vm8 = vmor %vm471_vm5, %vm472_vm3  ;;  %vm486_vm10 = vweird.f32 %v435_v15 }
 0x197   : > { %v468_v19 = vsub.f32 1.0, %v467_v16  ;;  %v459_v53 = vsel %vm1268_vm11, %v905_v12, %v455_v38  ;;  %v449_v1 = vsel %vm446_vm1, %v448_v57, %v444_v61 }
 0x198   : > { %v493_v50 = vor.u32 1.1754944e-38, %v492_v30  ;;  %vm491_vm13 = vcmp.eq.f32.partialorder %v490_v37, 8.507059e+37  ;;  %v464_v62 = vsel %vm461_vm15, %v463_v58, %v459_v53  ;;  %v496_v3 = vmul.f32 %v449_v1, %v1227_v56 }
 0x199   : > { %v469_v22 = vmul.f32 %v909_v14, %v468_v19  ;;  %v497_v2 = vmul.f32 %v464_v62, %v1229_v59  ;;  %v513_v59 = vpop.permute.xlu1 %512 }
 0x19b   : > { %v470_v29 = vadd.f32 %v909_v14, %v469_v22 }
 0x19c   : > { %v911_v23 = vpop.eup %910 }
 0x19d   : > { %v482_v24 = vmul.f32 %v911_v23, %v435_v15  ;;  %vm487_vm6 = vweird.f32 %v911_v23  ;;  %v474_v47 = vsel %vm1257_vm8, %v909_v14, %v470_v29 }
 0x19e   : > { %vm488_vm12 = vmor %vm486_vm10, %vm487_vm6  ;;  %v479_v55 = vsel %vm476_vm14, %v478_v51, %v474_v47 }
 0x19f   : > { %v483_v28 = vsub.f32 1.0, %v482_v24  ;;  %v498_v0 = vmul.f32 %v479_v55, %v1233_v63  ;;  %v523_v63 = vpop.permute.xlu2 %522 }
 0x1a1   : > { %v484_v36 = vmul.f32 %v911_v23, %v483_v28 }
 0x1a3   : > { %v485_v46 = vadd.f32 %v911_v23, %v484_v36 }
 0x1a5   : > { %v489_v52 = vsel %vm488_vm12, %v911_v23, %v485_v46 }
 0x1a6   : > { %v494_v54 = vsel %vm491_vm13, %v493_v50, %v489_v52 }
 0x1a7   : > { %v499_v60 = vmul.f32 %v494_v54, %v418_v7  ;;  %v508_v4 = vpop.permute.xlu2 %507 }
 0x1a9   : > { %545 = vmatpush.msrb.mxu0 %v499_v60  ;;  %797 = vmatpush.msra.mxu1 %v499_v60 }
 0x1ab   : > { %546 = vmatpush.msrb.mxu0 %v498_v0  ;;  %798 = vmatpush.msra.mxu1 %v498_v0 }
 0x1ad   : > { %547 = vmatpush.msrb.mxu0 %v497_v2  ;;  %799 = vmatpush.msra.mxu1 %v497_v2 }
 0x1af   : > { %548 = vmatpush.msrb.mxu0 %v496_v3  ;;  %800 = vmatpush.msra.mxu1 %v496_v3 }
 0x1b0   : > { %782 = vmatmul.msk.f32.vlgmr.msrb.gmra.mxu0 %vm382_vm0, %v1215_v45  ;;  %783 = vmatmul.msk.f32.vlgmr.msra.gmra.mxu1 %vm382_vm0, %v1206_v32  ;;  %v518_v32 = vpop.permute.xlu0 %517 }
 0x1b8   : > { %784 = vmatmul.msk.f32.gmra.mxu1 %vm382_vm0, %v1204_v31 }
 0x1c0   : > { %785 = vmatmul.msk.f32.gmra.mxu1 %vm382_vm0, %v1210_v34 }
 0x22d   : > { %v550_v5 = vpop.f32.mrf.mxu0  ;;  %v553_v6 = vpop.f32.mrf.mxu1 }
 0x22e   : > { %v1289_v56 = vadd.f32 %v550_v5, %v508_v4  ;;  %v1291_v7 = vadd.f32 %v553_v6, %v513_v59 }
 0x230   : > { %v786_v45 = vmul.f32 -1.442695, %v1289_v56  ;;  %v787_v8 = vmul.f32 -1.442695, %v1291_v7 }
 0x232   : > { %912 = vpow2.f32 %v786_v45 }
 0x233   : > { %914 = vpow2.f32 %v787_v8 }
 0x235   : > { %v556_v31 = vpop.f32.mrf.mxu1 }
 0x236   : > { %v1295_v9 = vadd.f32 %v556_v31, %v518_v32  ;;  %v647_v32 = vpop.permute.xlu0 %646 }
 0x238   : > { %v788_v34 = vmul.f32 -1.442695, %v1295_v9  ;;  %v913_v10 = vpop.eup %912 }
 0x239   : > { %v915_v11 = vpop.eup %914  ;;  %v1298_v12 = vadd.f32 1.0, %v913_v10 }
 0x23a   : > { %916 = vpow2.f32 %v788_v34  ;;  %v1300_v13 = vadd.f32 1.0, %v915_v11 }
 0x23b   : > { %918 = vrcp.f32 %v1298_v12  ;;  %vm583_vm3 = vweird.f32 %v1298_v12  ;;  %v587_v57 = vand.u32 2147483647, %v1298_v12  ;;  %v589_v60 = vand.u32 2147483648, %v1298_v12 }
 0x23c   : > { %920 = vrcp.f32 %v1300_v13  ;;  %vm598_vm8 = vweird.f32 %v1300_v13  ;;  %v602_v49 = vand.u32 2147483647, %v1300_v13  ;;  %v604_v50 = vand.u32 2147483648, %v1300_v13 }
 0x23d   : > { %v559_v14 = vpop.f32.mrf.mxu1  ;;  %v590_v4 = vor.u32 1.1754944e-38, %v589_v60 }
 0x23e   : > { %v560_v15 = vadd.f32 %v559_v14, %v523_v63  ;;  %v605_v2 = vor.u32 1.1754944e-38, %v604_v50  ;;  %vm603_vm1 = vcmp.eq.f32.partialorder %v602_v49, 8.507059e+37 }
 0x240   : > { %v917_v16 = vpop.eup %916  ;;  %v789_v17 = vmul.f32 -1.442695, %v560_v15 }
 0x241   : > { %v576_v18 = vadd.f32 1.0, %v917_v16  ;;  %v1304_v19 = vpop.eup %918 }
 0x242   : > { %922 = vpow2.f32 %v789_v17  ;;  %v921_v20 = vpop.eup %920  ;;  %v579_v27 = vmul.f32 %v1304_v19, %v1298_v12  ;;  %vm584_vm9 = vweird.f32 %v1304_v19 }
 0x243   : > { %924 = vrcp.f32 %v576_v18  ;;  %v594_v25 = vmul.f32 %v921_v20, %v1300_v13  ;;  %vm613_vm2 = vweird.f32 %v576_v18  ;;  %v617_v41 = vand.u32 2147483647, %v576_v18  ;;  %vm585_vm15 = vmor %vm583_vm3, %vm584_vm9 }
 0x244   : > { %v580_v30 = vsub.f32 1.0, %v579_v27  ;;  %v619_v43 = vand.u32 2147483648, %v576_v18  ;;  %vm599_vm5 = vweird.f32 %v921_v20 }
 0x245   : > { %v595_v28 = vsub.f32 1.0, %v594_v25  ;;  %vm1321_vm11 = vmor %vm598_vm8, %vm599_vm5  ;;  %vm618_vm14 = vcmp.eq.f32.partialorder %v617_v41, 8.507059e+37 }
 0x246   : > { %v581_v39 = vmul.f32 %v1304_v19, %v580_v30  ;;  %v620_v58 = vor.u32 1.1754944e-38, %v619_v43 }
 0x247   : > { %v596_v36 = vmul.f32 %v921_v20, %v595_v28 }
 0x248   : > { %v923_v21 = vpop.eup %922  ;;  %v582_v54 = vadd.f32 %v1304_v19, %v581_v39 }
 0x249   : > { %v925_v22 = vpop.eup %924  ;;  %v577_v23 = vadd.f32 1.0, %v923_v21  ;;  %v597_v47 = vadd.f32 %v921_v20, %v596_v36 }
 0x24a   : > { %v609_v24 = vmul.f32 %v925_v22, %v576_v18  ;;  %vm614_vm4 = vweird.f32 %v925_v22  ;;  %v586_v63 = vsel %vm585_vm15, %v1304_v19, %v582_v54 }
 0x24b   : > { %926 = vrcp.f32 %v577_v23  ;;  %v634_v40 = vand.u32 2147483648, %v577_v23  ;;  %v632_v46 = vand.u32 2147483647, %v577_v23  ;;  %vm1311_vm7 = vmor %vm613_vm2, %vm614_vm4  ;;  %vm628_vm10 = vweird.f32 %v577_v23 }
 0x24c   : > { %v610_v26 = vsub.f32 1.0, %v609_v24  ;;  %v601_v62 = vsel %vm1321_vm11, %v921_v20, %v597_v47  ;;  %vm588_vm2 = vcmp.eq.f32.partialorder %v587_v57, 8.507059e+37 }
 0x24d   : > { %v635_v55 = vor.u32 1.1754944e-38, %v634_v40  ;;  %vm633_vm13 = vcmp.eq.f32.partialorder %v632_v46, 8.507059e+37  ;;  %v606_v59 = vsel %vm603_vm1, %v605_v2, %v601_v62  ;;  %v591_v6 = vsel %vm588_vm2, %v590_v4, %v586_v63 }
 0x24e   : > { %v611_v29 = vmul.f32 %v925_v22, %v610_v26  ;;  %v639_v45 = vmul.f32 %v606_v59, %v1291_v7  ;;  %v638_v8 = vmul.f32 %v591_v6, %v1289_v56 }
 0x250   : > { %v612_v38 = vadd.f32 %v925_v22, %v611_v29 }
 0x251   : > { %v927_v33 = vpop.eup %926 }
 0x252   : > { %v624_v35 = vmul.f32 %v927_v33, %v577_v23  ;;  %vm629_vm6 = vweird.f32 %v927_v33  ;;  %v616_v52 = vsel %vm1311_vm7, %v925_v22, %v612_v38 }
 0x253   : > { %vm630_vm12 = vmor %vm628_vm10, %vm629_vm6  ;;  %v621_v1 = vsel %vm618_vm14, %v620_v58, %v616_v52 }
 0x254   : > { %v625_v37 = vsub.f32 1.0, %v624_v35  ;;  %v640_v5 = vmul.f32 %v621_v1, %v1295_v9 }
 0x256   : > { %v626_v44 = vmul.f32 %v927_v33, %v625_v37 }
 0x258   : > { %v627_v51 = vadd.f32 %v927_v33, %v626_v44 }
 0x25a   : > { %v631_v61 = vsel %vm630_vm12, %v927_v33, %v627_v51 }
 0x25b   : > { %v636_v0 = vsel %vm633_vm13, %v635_v55, %v631_v61 }
 0x25c   : > { %v641_v3 = vmul.f32 %v636_v0, %v560_v15 }
 0x25e   : > { %663 = vmatpush.msra.mxu2 %v641_v3 }
 0x260   : > { %664 = vmatpush.msra.mxu2 %v640_v5 }
 0x262   : > { %665 = vmatpush.msra.mxu2 %v639_v45 }
 0x264   : > { %666 = vmatpush.msra.mxu2 %v638_v8 }
 0x265   : > { %790 = vmatmul.msk.f32.vlgmr.msra.gmra.mxu2 %vm382_vm0, %v1213_v42 }
 0x2e8   : > { %v668_v31 = vpop.f32.mrf.mxu2 }
 0x2e9   : > { %v669_v9 = vadd.f32 %v668_v31, %v647_v32 }
 0x2eb   : > { %671 = vst [vmem:[%s176_s8] sm:$0x1] %v669_v9 }
 0x2ec   : > { %1015 = shalt.err (!%p1012_p9)
}
 0x2ed   : > { %807 = dma.vmem_to_hbm [thread:$0]  (%p1142_p13), %s684_s13, 16, %s686_s14, %s673_s15  }
 0x2ee PF: > { %s697_s25 = sand.u32 1, %s1046_s9   ;;  %p1392_p10 = scmp.ge.s32.totalorder %s1058_s12, 2 }
 0x2ef   : > { %s698_s3 = scalar_lea.sflag [#allocation4], %s697_s25 }
 0x2f0   : > { %p818_p11 = pnand %p1392_p10, %p1147_p4 }
 0x2f2   : > { %p819_p0 = pneg %p818_p11 }
 0x2f4   : > { %1041 = dma.done.wait (%p819_p0), %s698_s3, 16  }
 0x2f5   : > { %1043 = vsyncadd (%p819_p0), %s698_s3, 4294967280  ;;  %p16_p2 = scmp.ge.s32.totalorder %s1122_s23, 4   ;;  %s1393_s9 = smov %s1050_s10 }
 0x2f6   : > { %s1394_s10 = smov %s1054_s11  ;;  %s1395_s11 = smov %s1134_s26 }
 0x2f7   : > { %s1396_s12 = smov %s1122_s23  ;;  %18 = sbr.rel (!%p16_p2) target bundleno = 6 (0x6), region = 80 }
 0x2fc   :  { %703 = vsyncpa [#allocation3], 1 }
 0x2fd   :  { %705 = vsyncpa [#allocation3 + $0x1], 1 }
 0x2fe   :  { %706 = vsyncpa [#allocation6], 1 }
 0x2ff   :  { %707 = vsyncpa [#allocation4], 1 }
 0x300   :  { %709 = vsyncpa [#allocation4 + $0x1], 1 }

</bundles_post_ra>
